<compile_context>
chip_gen: v6e
topology: v6e:2x2x1
jax: 0.10.0
libtpu: 0.0.40
codegen_flags: <defaults>
</compile_context>

<pallas_src>
import functools

import jax
import jax.numpy as jnp
from jax.experimental import pallas as pl
from jax.experimental.pallas import tpu as pltpu


def _round_up(x, m):
    return (x + m - 1) // m * m


def _pad2(a, rows, cols):
    r, c = a.shape
    if r == rows and c == cols:
        return a
    return jnp.pad(a, ((0, rows - r), (0, cols - c)))


def _activation(z, beta):
    """ReLU (beta == 0) or PyTorch-style Softplus(beta) with threshold=20."""
    if beta > 0:
        zb = z * beta
        sp = jnp.where(zb > 20.0, zb, jnp.log1p(jnp.exp(jnp.minimum(zb, 20.0))))
        return sp * (1.0 / beta)
    return jnp.maximum(z, 0.0)


def _fc_stack(x, w0, b0, w1, b1, beta):
    """dx = fc_1(act(fc_0(act(x)))) with f32 accumulation, low-precision operands."""
    a0 = _activation(x, beta)                      # stays in input dtype (bf16-friendly)
    net = jnp.dot(a0, w0, preferred_element_type=jnp.float32) + b0
    a1 = _activation(net, beta).astype(w1.dtype)   # back to MXU operand dtype
    dx = jnp.dot(a1, w1, preferred_element_type=jnp.float32) + b1
    return dx


def _resblock_kernel_identity(x_ref, w0_ref, b0_ref, w1_ref, b1_ref, o_ref, *, beta):
    """Identity shortcut: out = x + dx (no shortcut matmul, no ws DMA)."""
    x = x_ref[...]
    dx = _fc_stack(x, w0_ref[...], b0_ref[...], w1_ref[...], b1_ref[...], beta)
    o_ref[...] = (x.astype(jnp.float32) + dx).astype(o_ref.dtype)


def _resblock_kernel_proj(x_ref, w0_ref, b0_ref, w1_ref, b1_ref, ws_ref, o_ref, *, beta):
    """Projection shortcut: out = x @ ws + dx (ws has no bias)."""
    x = x_ref[...]
    dx = _fc_stack(x, w0_ref[...], b0_ref[...], w1_ref[...], b1_ref[...], beta)
    x_s = jnp.dot(x, ws_ref[...], preferred_element_type=jnp.float32)
    o_ref[...] = (x_s + dx).astype(o_ref.dtype)


def resnet_block_fc(x, w0, b0, w1, b1, ws=None, *, beta=0.0, tm=512):
    """x: (N, size_in) -> (N, size_out).

    w0: (size_in, size_h), b0: (size_h,), w1: (size_h, size_out), b1: (size_out,)
    ws: (size_in, size_out) or None (identity shortcut, requires size_in == size_out).
    Weights are pre-transposed to (in, out). Compute dtype follows x.dtype
    (bf16 in -> bf16 MXU operands, f32 accumulation, bf16 out).
    """
    N, size_in = x.shape
    size_h = w0.shape[1]
    size_out = w1.shape[1]
    identity = ws is None
    if identity:
        assert size_in == size_out, "identity shortcut requires size_in == size_out"

    LANE, SUB = 128, 8
    dt = x.dtype

    # Lane-dense hidden/output features (unmasked vst on the store path).
    size_h_p = _round_up(size_h, LANE)
    size_out_p = _round_up(size_out, LANE)
    # Identity path adds x to the (padded) output, so x must share the padded
    # lane width; projection path keeps x unpadded (no extra HBM read traffic).
    size_in_p = size_out_p if identity else size_in

    # Batch tile: as large as requested (default 512), whole batch if smaller.
    tm_eff = _round_up(min(tm, _round_up(N, SUB)), SUB)
    n_p = _round_up(N, tm_eff)

    xp = x
    if n_p != N or size_in_p != size_in:
        xp = jnp.pad(x, ((0, n_p - N), (0, size_in_p - size_in)))

    # Weights in the MXU operand dtype; biases in f32 (added to f32 accumulator).
    w0p = _pad2(w0.astype(dt), size_in_p, size_h_p)
    w1p = _pad2(w1.astype(dt), size_h_p, size_out_p)
    b0p = _pad2(b0.reshape(1, -1).astype(jnp.float32), 1, size_h_p)
    b1p = _pad2(b1.reshape(1, -1).astype(jnp.float32), 1, size_out_p)

    in_specs = [
        pl.BlockSpec((tm_eff, size_in_p), lambda i: (i, 0)),        # x tile (streams)
        pl.BlockSpec((size_in_p, size_h_p), lambda i: (0, 0)),      # w0 (resident)
        pl.BlockSpec((1, size_h_p), lambda i: (0, 0)),              # b0
        pl.BlockSpec((size_h_p, size_out_p), lambda i: (0, 0)),     # w1 (resident)
        pl.BlockSpec((1, size_out_p), lambda i: (0, 0)),            # b1
    ]
    args = [xp, w0p, b0p, w1p, b1p]
    weight_bytes = w0p.size + w1p.size

    if identity:
        kernel = functools.partial(_resblock_kernel_identity, beta=float(beta))
    else:
        wsp = _pad2(ws.astype(dt), size_in_p, size_out_p)
        in_specs.append(pl.BlockSpec((size_in_p, size_out_p), lambda i: (0, 0)))
        args.append(wsp)
        weight_bytes += wsp.size
        kernel = functools.partial(_resblock_kernel_proj, beta=float(beta))

    # VMEM budget: double-buffered x/out tiles + weight blocks + f32 biases.
    itemsize = jnp.dtype(dt).itemsize
    need = (2 * tm_eff * (size_in_p + size_out_p) * itemsize
            + 2 * weight_bytes * itemsize
            + 2 * (size_h_p + size_out_p) * 4)
    vmem_limit = int(min(max(2 * need, 32 * 2**20), 48 * 2**20))  # safe on v5e/v6e/v7x

    out = pl.pallas_call(
        kernel,
        out_shape=jax.ShapeDtypeStruct((n_p, size_out_p), dt),
        grid_spec=pltpu.PrefetchScalarGridSpec(
            num_scalar_prefetch=0,
            grid=(n_p // tm_eff,),
            in_specs=in_specs,
            out_specs=pl.BlockSpec((tm_eff, size_out_p), lambda i: (i, 0)),
        ),
        compiler_params=pltpu.CompilerParams(
            dimension_semantics=("parallel",),
            vmem_limit_bytes=vmem_limit,
        ),
    )(*args)

    return out[:N, :size_out]


def init_params(key, size_in, size_out=None, size_h=None, dtype=jnp.float32,
                zero_init_fc1=True):
    """Init matching ResnetBlockFC.__init__ (weights already transposed to (in, out)).

    fc_0: kaiming_normal (fan_in), zero bias; fc_1: zero weight (unless
    zero_init_fc1=False, for testing), zero bias; shortcut only if
    size_in != size_out (kaiming_normal, no bias) — otherwise ws is None.
    """
    if size_out is None:
        size_out = size_in
    if size_h is None:
        size_h = min(size_in, size_out)
    k0, k1, ks = jax.random.split(key, 3)
    std0 = (2.0 / size_in) ** 0.5
    w0 = jax.random.normal(k0, (size_in, size_h), dtype) * std0
    b0 = jnp.zeros((size_h,), dtype)
    if zero_init_fc1:
        w1 = jnp.zeros((size_h, size_out), dtype)
    else:
        w1 = jax.random.normal(k1, (size_h, size_out), dtype) * (2.0 / size_h) ** 0.5
    b1 = jnp.zeros((size_out,), dtype)
    ws = None if size_in == size_out else jax.random.normal(ks, (size_in, size_out), dtype) * std0
    return w0, b0, w1, b1, ws


def reference(x, w0, b0, w1, b1, ws=None, beta=0.0):
    a0 = _activation(x, beta)
    net = a0 @ w0 + b0
    a1 = _activation(net, beta)
    dx = a1 @ w1 + b1
    x_s = x if ws is None else x @ ws
    return x_s + dx


if __name__ == "__main__":
    key = jax.random.PRNGKey(0)
    k1, k2, k3, k4 = jax.random.split(key, 4)

    # --- Case 1: projection shortcut (size_in != size_out), f32, ragged batch ---
    N, size_in, size_out = 200, 32, 64
    x = jax.random.normal(k1, (N, size_in), jnp.float32)
    w0, b0, w1, b1, ws = init_params(k2, size_in, size_out, zero_init_fc1=False)
    out = jax.block_until_ready(resnet_block_fc(x, w0, b0, w1, b1, ws))
    ref = reference(x, w0, b0, w1, b1, ws)
    assert out.shape == (N, size_out)
    assert jnp.allclose(out, ref, atol=1e-4, rtol=1e-4)

    # --- Case 2: identity shortcut (no shortcut matmul), Softplus(beta=1), f32 ---
    N2, size2 = 256, 48
    x2 = jax.random.normal(k3, (N2, size2), jnp.float32)
    w0b, b0b, w1b, b1b, wsb = init_params(k4, size2, zero_init_fc1=False)
    assert wsb is None
    out2 = jax.block_until_ready(resnet_block_fc(x2, w0b, b0b, w1b, b1b, None, beta=1.0))
    ref2 = reference(x2, w0b, b0b, w1b, b1b, None, beta=1.0)
    assert out2.shape == (N2, size2)
    assert jnp.allclose(out2, ref2, atol=1e-4, rtol=1e-4)

    # --- Case 3: bf16 activations/weights (native MXU operands, f32 accumulation) ---
    xb = x.astype(jnp.bfloat16)
    outb = jax.block_until_ready(resnet_block_fc(xb, w0, b0, w1, b1, ws))
    refb = reference(
        xb.astype(jnp.float32),
        w0.astype(jnp.bfloat16).astype(jnp.float32), b0,
        w1.astype(jnp.bfloat16).astype(jnp.float32), b1,
        ws.astype(jnp.bfloat16).astype(jnp.float32),
    )
    assert outb.dtype == jnp.bfloat16
    assert jnp.allclose(outb.astype(jnp.float32), refb, atol=0.15, rtol=0.1)

    print("KERNEL_OK")
</pallas_src>

<mosaic_0001>
module attributes {stable_mosaic.version = 11 : i64} {
  func.func @_resblock_kernel_proj(%arg0: i32, %arg1: memref<200x32xf32, #tpu.memory_space<vmem>>, %arg2: memref<32x128xf32, #tpu.memory_space<vmem>>, %arg3: memref<1x128xf32, #tpu.memory_space<vmem>>, %arg4: memref<128x128xf32, #tpu.memory_space<vmem>>, %arg5: memref<1x128xf32, #tpu.memory_space<vmem>>, %arg6: memref<32x128xf32, #tpu.memory_space<vmem>>, %arg7: memref<200x128xf32, #tpu.memory_space<vmem>>) attributes {dimension_semantics = [#tpu.dimension_semantics<parallel>], iteration_bounds = array<i64: 1>, scalar_prefetch = 0 : i64, scratch_operands = 0 : i64, tpu.core_type = #tpu.core_type<tc>, window_params = [{transform_indices = @transform_0, window_bounds = array<i64: 200, 32>}, {pipeline_mode = #tpu.pipeline_mode<synchronous>, transform_indices = @transform_1, window_bounds = array<i64: 32, 128>}, {pipeline_mode = #tpu.pipeline_mode<synchronous>, transform_indices = @transform_2, window_bounds = array<i64: 1, 128>}, {pipeline_mode = #tpu.pipeline_mode<synchronous>, transform_indices = @transform_3, window_bounds = array<i64: 128, 128>}, {pipeline_mode = #tpu.pipeline_mode<synchronous>, transform_indices = @transform_4, window_bounds = array<i64: 1, 128>}, {pipeline_mode = #tpu.pipeline_mode<synchronous>, transform_indices = @transform_5, window_bounds = array<i64: 32, 128>}, {transform_indices = @transform_6, window_bounds = array<i64: 200, 128>}]} {
    %c0 = arith.constant 0 : index
    %c0_0 = arith.constant 0 : index
    %0 = vector.load %arg1[%c0, %c0_0] : memref<200x32xf32, #tpu.memory_space<vmem>>, vector<200x32xf32>
    %c0_1 = arith.constant 0 : index
    %c0_2 = arith.constant 0 : index
    %1 = vector.load %arg2[%c0_1, %c0_2] : memref<32x128xf32, #tpu.memory_space<vmem>>, vector<32x128xf32>
    %c0_3 = arith.constant 0 : index
    %c0_4 = arith.constant 0 : index
    %2 = vector.load %arg3[%c0_3, %c0_4] : memref<1x128xf32, #tpu.memory_space<vmem>>, vector<1x128xf32>
    %c0_5 = arith.constant 0 : index
    %c0_6 = arith.constant 0 : index
    %3 = vector.load %arg4[%c0_5, %c0_6] : memref<128x128xf32, #tpu.memory_space<vmem>>, vector<128x128xf32>
    %c0_7 = arith.constant 0 : index
    %c0_8 = arith.constant 0 : index
    %4 = vector.load %arg5[%c0_7, %c0_8] : memref<1x128xf32, #tpu.memory_space<vmem>>, vector<1x128xf32>
    %cst = arith.constant 0.000000e+00 : f32
    %5 = vector.broadcast %cst : f32 to vector<200x32xf32>
    %6 = arith.maximumf %0, %5 : vector<200x32xf32>
    %cst_9 = arith.constant dense<0.000000e+00> : vector<200x128xf32>
    %7 = tpu.matmul %6, %1, %cst_9 {dimension_numbers = #tpu.dot_dimension_numbers<[1], [0], [0], [1], [0, 0, 1, 1], [], []>} : vector<200x32xf32>, vector<32x128xf32>, vector<200x128xf32> -> vector<200x128xf32>
    %8 = vector.broadcast %2 : vector<1x128xf32> to vector<200x128xf32>
    %9 = arith.addf %7, %8 : vector<200x128xf32>
    %cst_10 = arith.constant 0.000000e+00 : f32
    %10 = vector.broadcast %cst_10 : f32 to vector<200x128xf32>
    %11 = arith.maximumf %9, %10 : vector<200x128xf32>
    %cst_11 = arith.constant dense<0.000000e+00> : vector<200x128xf32>
    %12 = tpu.matmul %11, %3, %cst_11 {dimension_numbers = #tpu.dot_dimension_numbers<[1], [0], [0], [1], [0, 0, 1, 1], [], []>} : vector<200x128xf32>, vector<128x128xf32>, vector<200x128xf32> -> vector<200x128xf32>
    %13 = vector.broadcast %4 : vector<1x128xf32> to vector<200x128xf32>
    %14 = arith.addf %12, %13 : vector<200x128xf32>
    %c0_12 = arith.constant 0 : index
    %c0_13 = arith.constant 0 : index
    %15 = vector.load %arg6[%c0_12, %c0_13] : memref<32x128xf32, #tpu.memory_space<vmem>>, vector<32x128xf32>
    %cst_14 = arith.constant dense<0.000000e+00> : vector<200x128xf32>
    %16 = tpu.matmul %0, %15, %cst_14 {dimension_numbers = #tpu.dot_dimension_numbers<[1], [0], [0], [1], [0, 0, 1, 1], [], []>} : vector<200x32xf32>, vector<32x128xf32>, vector<200x128xf32> -> vector<200x128xf32>
    %17 = arith.addf %16, %14 : vector<200x128xf32>
    %c0_15 = arith.constant 0 : index
    %c0_16 = arith.constant 0 : index
    %18 = vector.load %arg7[%c0_15, %c0_16] : memref<200x128xf32, #tpu.memory_space<vmem>>, vector<200x128xf32>
    tpu.vector_store %arg7[%c0_15, %c0_16], %17 {strides = array<i32>} : memref<200x128xf32, #tpu.memory_space<vmem>>, vector<200x128xf32>,
    return
  }
  func.func @transform_0(%arg0: i32) -> (i32, i32) {
    %c0_i32 = arith.constant 0 : i32
    %c0_i32_0 = arith.constant 0 : i32
    return %arg0, %c0_i32 : i32, i32
  }
  func.func @transform_1(%arg0: i32) -> (i32, i32) {
    %c0_i32 = arith.constant 0 : i32
    %c0_i32_0 = arith.constant 0 : i32
    %c0_i32_1 = arith.constant 0 : i32
    return %c0_i32, %c0_i32_0 : i32, i32
  }
  func.func @transform_2(%arg0: i32) -> (i32, i32) {
    %c0_i32 = arith.constant 0 : i32
    %c0_i32_0 = arith.constant 0 : i32
    %c0_i32_1 = arith.constant 0 : i32
    return %c0_i32, %c0_i32_0 : i32, i32
  }
  func.func @transform_3(%arg0: i32) -> (i32, i32) {
    %c0_i32 = arith.constant 0 : i32
    %c0_i32_0 = arith.constant 0 : i32
    %c0_i32_1 = arith.constant 0 : i32
    return %c0_i32, %c0_i32_0 : i32, i32
  }
  func.func @transform_4(%arg0: i32) -> (i32, i32) {
    %c0_i32 = arith.constant 0 : i32
    %c0_i32_0 = arith.constant 0 : i32
    %c0_i32_1 = arith.constant 0 : i32
    return %c0_i32, %c0_i32_0 : i32, i32
  }
  func.func @transform_5(%arg0: i32) -> (i32, i32) {
    %c0_i32 = arith.constant 0 : i32
    %c0_i32_0 = arith.constant 0 : i32
    %c0_i32_1 = arith.constant 0 : i32
    return %c0_i32, %c0_i32_0 : i32, i32
  }
  func.func @transform_6(%arg0: i32) -> (i32, i32) {
    %c0_i32 = arith.constant 0 : i32
    %c0_i32_0 = arith.constant 0 : i32
    return %arg0, %c0_i32 : i32, i32
  }
}

</mosaic_0001>

<bundles_post_ra>
// kernel: tpu_custom_call.1
= control target key start
LH: loop header
LB: loop body
LE: loop exit
PB: predicated region body
PF: predicated region fallthrough
CT: control target
= control target key end

     0   :  { %v1358_v1 = vmov 0.0   ;;  %vm1359_vm0 = vmmov 0   ;;  %vm102_vm1 = vcmask 261120   ;;  %s2035_s0 = inlined_call_operand.vmem [shape: f32[200,32], index: 0, kind: input, shape index: {}]   ;;  %s2036_s1 = inlined_call_operand.vmem [shape: f32[32,128], index: 1, kind: input, shape index: {}]   ;;  %s2037_s2 = inlined_call_operand.vmem [shape: f32[1,128], index: 2, kind: input, shape index: {}]   ;;  %s2038_s3 = inlined_call_operand.vmem [shape: f32[128,128], index: 3, kind: input, shape index: {}]   ;;  %s2039_s4 = inlined_call_operand.vmem [shape: f32[1,128], index: 4, kind: input, shape index: {}]   ;;  %s2040_s5 = inlined_call_operand.vmem [shape: f32[32,128], index: 5, kind: input, shape index: {}]   ;;  %s2041_s6 = inlined_call_operand.hbm [shape: f32[200,128], index: 6, kind: output, shape index: {}]  }
   0x1   :  { %v52_v0 = vld [vmem:[%s2036_s1 + $0x18] sm:$0xff]  ;;  %1050 = vmatprep.subr.mxu0 %v1358_v1  ;;  %v51_v2 = vld [vmem:[%s2036_s1 + $0x10] sm:$0xff]  ;;  %1058 = vmatprep.mubr.msk.f32.mxu0 %vm1359_vm0, %v1358_v1  ;;  %v1410_v3 = vld [vmem:[%s2035_s0] sm:$0xff] }
   0x2   :  { %1051 = vmatpush3.msra.mxu0 %v52_v0  ;;  %1323 = vmatprep.subr.mxu1 %v1358_v1  ;;  %v50_v4 = vld [vmem:[%s2036_s1 + $0x8] sm:$0xff]  ;;  %v49_v5 = vld [vmem:[%s2036_s1] sm:$0xff]  ;;  %v71_v6 = vmax.f32 %v1410_v3, 0.0  ;;  %v1440_v10 = vld [vmem:[%s2035_s0 + $0x70] sm:$0xff] }
   0x3   :  { %1052 = vmatprep.subr.mxu0 %v1358_v1  ;;  %1327 = vmatpush3.msra.mxu1 %v52_v0  ;;  %v1426_v7 = vld [vmem:[%s2035_s0 + $0x68] sm:$0xff]  ;;  %v592_v12 = vld [vmem:[%s2040_s5 + $0x18] sm:$0xff]  ;;  %v1452_v13 = vld [vmem:[%s2035_s0 + $0x10] sm:$0xff]  ;;  %v85_v14 = vmax.f32 %v1440_v10, 0.0 }
   0x4   :  { %1053 = vmatpush3.msra.mxu0 %v51_v2  ;;  %1324 = vmatprep.subr.mxu1 %v1358_v1  ;;  %v1431_v8 = vld [vmem:[%s2035_s0 + $0x8] sm:$0xff]  ;;  %v84_v9 = vmax.f32 %v1426_v7, 0.0  ;;  %v69_v15 = vld [vmem:[%s2038_s3 + $0x78] sm:$0xff]  ;;  %v73_v17 = vmax.f32 %v1452_v13, 0.0  ;;  %v68_v18 = vld [vmem:[%s2038_s3 + $0x70] sm:$0xff] }
   0x5   :  { %1054 = vmatprep.subr.mxu0 %v1358_v1  ;;  %1328 = vmatpush3.msra.mxu1 %v51_v2  ;;  %v72_v11 = vmax.f32 %v1431_v8, 0.0  ;;  %v1467_v16 = vld [vmem:[%s2035_s0 + $0x78] sm:$0xff]  ;;  %v67_v21 = vld [vmem:[%s2038_s3 + $0x68] sm:$0xff]  ;;  %v1493_v22 = vld [vmem:[%s2035_s0 + $0x80] sm:$0xff] }
   0x6   :  { %1055 = vmatpush3.msra.mxu0 %v50_v4  ;;  %1325 = vmatprep.subr.mxu1 %v1358_v1  ;;  %v1480_v19 = vld [vmem:[%s2035_s0 + $0x18] sm:$0xff]  ;;  %v86_v20 = vmax.f32 %v1467_v16, 0.0 }
   0x7   :  { %1056 = vmatprep.subr.mxu0 %v1358_v1  ;;  %1329 = vmatpush3.msra.mxu1 %v50_v4 }
   0x8   :  { %1057 = vmatpush3.msra.mxu0 %v49_v5  ;;  %1326 = vmatprep.subr.mxu1 %v1358_v1 }
   0x9   :  { %1059 = vmatmul.mubr.msk.f32.vlgmr.msra.gmra.mxu0 %vm102_vm1, %v71_v6  ;;  %1330 = vmatpush3.msra.mxu1 %v49_v5 }
   0xa   :  { %1061 = vmatprep.mubr.msk.f32.mxu0 %vm1359_vm0, %v1358_v1  ;;  %1097 = vmatprep.mubr.msk.f32.mxu1 %vm1359_vm0, %v1358_v1 }
   0xb   :  { %1098 = vmatmul.mubr.msk.f32.vlgmr.msra.gmra.mxu1 %vm102_vm1, %v84_v9  ;;  %1240 = vmatprep.subr.mxu0 %v1358_v1 }
   0xc   :  { %1100 = vmatprep.mubr.msk.f32.mxu1 %vm1359_vm0, %v1358_v1  ;;  %1241 = vmatpush3.msra.mxu0 %v592_v12 }
   0xd   :  { %1062 = vmatmul.mubr.msk.f32.gmra.mxu0 %vm102_vm1, %v72_v11  ;;  %1133 = vmatprep.subr.mxu1 %v1358_v1 }
   0xe   :  { %1064 = vmatprep.mubr.msk.f32.mxu0 %vm1359_vm0, %v1358_v1  ;;  %1134 = vmatpush3.msra.mxu1 %v69_v15 }
   0xf   :  { %1101 = vmatmul.mubr.msk.f32.gmra.mxu1 %vm102_vm1, %v85_v14  ;;  %1135 = vmatprep.subr.mxu1 %v1358_v1 }
  0x10   :  { %1103 = vmatprep.mubr.msk.f32.mxu1 %vm1359_vm0, %v1358_v1  ;;  %1136 = vmatpush3.msra.mxu1 %v68_v18 }
  0x11   :  { %11 = vsyncpa [#allocation3], 0  ;;  %1065 = vmatmul.mubr.msk.f32.gmra.mxu0 %vm102_vm1, %v73_v17  ;;  %v74_v23 = vmax.f32 %v1480_v19, 0.0  ;;  %1137 = vmatprep.subr.mxu1 %v1358_v1  ;;  %v66_v24 = vld [vmem:[%s2038_s3 + $0x60] sm:$0xff]  ;;  %v87_v26 = vmax.f32 %v1493_v22, 0.0  ;;  %v1516_v27 = vld [vmem:[%s2035_s0 + $0x88] sm:$0xff] }
  0x12   :  { %1067 = vmatprep.mubr.msk.f32.mxu0 %vm1359_vm0, %v1358_v1  ;;  %v1506_v25 = vld [vmem:[%s2035_s0 + $0x20] sm:$0xff]  ;;  %1138 = vmatpush3.msra.mxu1 %v67_v21  ;;  %v591_v28 = vld [vmem:[%s2040_s5 + $0x10] sm:$0xff]  ;;  %v65_v30 = vld [vmem:[%s2038_s3 + $0x58] sm:$0xff]  ;;  %v88_v32 = vmax.f32 %v1516_v27, 0.0 }
  0x13   :  { %1104 = vmatmul.mubr.msk.f32.gmra.mxu1 %vm102_vm1, %v86_v20  ;;  %1139 = vmatprep.subr.mxu1 %v1358_v1  ;;  %v75_v29 = vmax.f32 %v1506_v25, 0.0  ;;  %v1532_v31 = vld [vmem:[%s2035_s0 + $0x28] sm:$0xff]  ;;  %v64_v33 = vld [vmem:[%s2038_s3 + $0x50] sm:$0xff]  ;;  %v62_v39 = vld [vmem:[%s2038_s3 + $0x40] sm:$0xff] }
  0x14   :  { %1106 = vmatprep.mubr.msk.f32.mxu1 %vm1359_vm0, %v1358_v1  ;;  %1140 = vmatpush3.msra.mxu1 %v66_v24  ;;  %v1545_v34 = vld [vmem:[%s2035_s0 + $0x90] sm:$0xff]  ;;  %v76_v35 = vmax.f32 %v1532_v31, 0.0  ;;  %v63_v36 = vld [vmem:[%s2038_s3 + $0x48] sm:$0xff]  ;;  %v1571_v40 = vld [vmem:[%s2035_s0 + $0x98] sm:$0xff] }
  0x15   :  { %1068 = vmatmul.mubr.msk.f32.gmra.mxu0 %vm102_vm1, %v74_v23  ;;  %1242 = vmatprep.subr.mxu0 %v1358_v1  ;;  %v1558_v37 = vld [vmem:[%s2035_s0 + $0x30] sm:$0xff]  ;;  %v89_v38 = vmax.f32 %v1545_v34, 0.0  ;;  %v1581_v42 = vld [vmem:[%s2035_s0 + $0x38] sm:$0xff]  ;;  %v90_v44 = vmax.f32 %v1571_v40, 0.0  ;;  %v590_v45 = vld [vmem:[%s2040_s5 + $0x8] sm:$0xff] }
  0x16   :  { %1070 = vmatprep.mubr.msk.f32.mxu0 %vm1359_vm0, %v1358_v1  ;;  %1141 = vmatprep.subr.mxu1 %v1358_v1  ;;  %v77_v41 = vmax.f32 %v1558_v37, 0.0  ;;  %v61_v43 = vld [vmem:[%s2038_s3 + $0x38] sm:$0xff]  ;;  %v1597_v46 = vld [vmem:[%s2035_s0 + $0xa0] sm:$0xff]  ;;  %v78_v47 = vmax.f32 %v1581_v42, 0.0  ;;  %v60_v48 = vld [vmem:[%s2038_s3 + $0x30] sm:$0xff] }
  0x17   :  { %1107 = vmatmul.mubr.msk.f32.gmra.mxu1 %vm102_vm1, %v87_v26  ;;  %1243 = vmatpush3.msra.mxu0 %v591_v28  ;;  %v1610_v49 = vld [vmem:[%s2035_s0 + $0x40] sm:$0xff]  ;;  %v91_v50 = vmax.f32 %v1597_v46, 0.0  ;;  %v59_v51 = vld [vmem:[%s2038_s3 + $0x28] sm:$0xff]  ;;  %v57_v57 = vld [vmem:[%s2038_s3 + $0x18] sm:$0xff] }
  0x18   :  { %1109 = vmatprep.mubr.msk.f32.mxu1 %vm1359_vm0, %v1358_v1  ;;  %1142 = vmatpush3.msra.mxu1 %v65_v30  ;;  %v1623_v52 = vld [vmem:[%s2035_s0 + $0xa8] sm:$0xff]  ;;  %v79_v53 = vmax.f32 %v1610_v49, 0.0  ;;  %v58_v54 = vld [vmem:[%s2038_s3 + $0x20] sm:$0xff]  ;;  %v1649_v58 = vld [vmem:[%s2035_s0 + $0xb0] sm:$0xff] }
  0x19   :  { %1071 = vmatmul.mubr.msk.f32.gmra.mxu0 %vm102_vm1, %v75_v29  ;;  %1143 = vmatprep.subr.mxu1 %v1358_v1  ;;  %v1636_v55 = vld [vmem:[%s2035_s0 + $0x48] sm:$0xff]  ;;  %v92_v56 = vmax.f32 %v1623_v52, 0.0  ;;  %v589_v60 = vld [vmem:[%s2040_s5] sm:$0xff]  ;;  %v34_v61 = vld [vmem:[%s2035_s0 + $0x50] sm:$0xff]  ;;  %v93_v62 = vmax.f32 %v1649_v58, 0.0 }
  0x1a   :  { %1073 = vmatprep.mubr.msk.f32.mxu0 %vm1359_vm0, %v1358_v1  ;;  %1144 = vmatpush3.msra.mxu1 %v64_v33  ;;  %v80_v59 = vmax.f32 %v1636_v55, 0.0  ;;  %v56_v63 = vld [vmem:[%s2038_s3 + $0x10] sm:$0xff]  ;;  %v1673_v0 = vld [vmem:[%s2035_s0 + $0xb8] sm:$0xff]  ;;  %v81_v2 = vmax.f32 %v34_v61, 0.0  ;;  %v55_v4 = vld [vmem:[%s2038_s3 + $0x8] sm:$0xff] }
  0x1b   :  { %1110 = vmatmul.mubr.msk.f32.gmra.mxu1 %vm102_vm1, %v88_v32  ;;  %1145 = vmatprep.subr.mxu1 %v1358_v1  ;;  %v35_v5 = vld [vmem:[%s2035_s0 + $0x58] sm:$0xff]  ;;  %v94_v6 = vmax.f32 %v1673_v0, 0.0  ;;  %v1693_v9 = vld [vmem:[%s2035_s0 + $0xc0] sm:$0xff] }
  0x1c   :  { %1112 = vmatprep.mubr.msk.f32.mxu1 %vm1359_vm0, %v1358_v1  ;;  %1146 = vmatpush3.msra.mxu1 %v63_v36  ;;  %v82_v11 = vmax.f32 %v35_v5, 0.0  ;;  %v36_v12 = vld [vmem:[%s2035_s0 + $0x60] sm:$0xff]  ;;  %v95_v14 = vmax.f32 %v1693_v9, 0.0 }
  0x1d   :  { %1074 = vmatmul.mubr.msk.f32.gmra.mxu0 %vm102_vm1, %v76_v35  ;;  %1147 = vmatprep.subr.mxu1 %v1358_v1  ;;  %v83_v15 = vmax.f32 %v36_v12, 0.0 }
  0x1e   :  { %1076 = vmatprep.mubr.msk.f32.mxu0 %vm1359_vm0, %v1358_v1  ;;  %1148 = vmatpush3.msra.mxu1 %v62_v39 }
  0x1f   :  { %1113 = vmatmul.mubr.msk.f32.gmra.mxu1 %vm102_vm1, %v89_v38  ;;  %1149 = vmatprep.subr.mxu1 %v1358_v1 }
  0x20   :  { %1115 = vmatprep.mubr.msk.f32.mxu1 %vm1359_vm0, %v1358_v1  ;;  %1244 = vmatprep.subr.mxu0 %v1358_v1 }
  0x21   :  { %1077 = vmatmul.mubr.msk.f32.gmra.mxu0 %vm102_vm1, %v77_v41  ;;  %1150 = vmatpush3.msra.mxu1 %v61_v43 }
  0x22   :  { %1079 = vmatprep.mubr.msk.f32.mxu0 %vm1359_vm0, %v1358_v1  ;;  %1245 = vmatpush3.msra.mxu0 %v590_v45 }
  0x23   :  { %1116 = vmatmul.mubr.msk.f32.gmra.mxu1 %vm102_vm1, %v90_v44  ;;  %1151 = vmatprep.subr.mxu1 %v1358_v1 }
  0x24   :  { %1118 = vmatprep.mubr.msk.f32.mxu1 %vm1359_vm0, %v1358_v1  ;;  %1152 = vmatpush3.msra.mxu1 %v60_v48 }
  0x25   :  { %1080 = vmatmul.mubr.msk.f32.gmra.mxu0 %vm102_vm1, %v78_v47  ;;  %1153 = vmatprep.subr.mxu1 %v1358_v1 }
  0x26   :  { %1082 = vmatprep.mubr.msk.f32.mxu0 %vm1359_vm0, %v1358_v1  ;;  %1154 = vmatpush3.msra.mxu1 %v59_v51 }
  0x27   :  { %1119 = vmatmul.mubr.msk.f32.gmra.mxu1 %vm102_vm1, %v91_v50  ;;  %1155 = vmatprep.subr.mxu1 %v1358_v1 }
  0x28   :  { %1121 = vmatprep.mubr.msk.f32.mxu1 %vm1359_vm0, %v1358_v1  ;;  %1156 = vmatpush3.msra.mxu1 %v58_v54 }
  0x29   :  { %1083 = vmatmul.mubr.msk.f32.gmra.mxu0 %vm102_vm1, %v79_v53  ;;  %1157 = vmatprep.subr.mxu1 %v1358_v1 }
  0x2a   :  { %1085 = vmatprep.mubr.msk.f32.mxu0 %vm1359_vm0, %v1358_v1  ;;  %1158 = vmatpush3.msra.mxu1 %v57_v57 }
  0x2b   :  { %1122 = vmatmul.mubr.msk.f32.gmra.mxu1 %vm102_vm1, %v92_v56  ;;  %1246 = vmatprep.subr.mxu0 %v1358_v1 }
  0x2c   :  { %1124 = vmatprep.mubr.msk.f32.mxu1 %vm1359_vm0, %v1358_v1  ;;  %1247 = vmatpush3.msra.mxu0 %v589_v60 }
  0x2d   :  { %1086 = vmatmul.mubr.msk.f32.gmra.mxu0 %vm102_vm1, %v80_v59  ;;  %1159 = vmatprep.subr.mxu1 %v1358_v1 }
  0x2e   :  { %1088 = vmatprep.mubr.msk.f32.mxu0 %vm1359_vm0, %v1358_v1  ;;  %1160 = vmatpush3.msra.mxu1 %v56_v63 }
  0x2f   :  { %1125 = vmatmul.mubr.msk.f32.gmra.mxu1 %vm102_vm1, %v93_v62  ;;  %1161 = vmatprep.subr.mxu1 %v1358_v1 }
  0x30   :  { %1127 = vmatprep.mubr.msk.f32.mxu1 %vm1359_vm0, %v1358_v1  ;;  %1162 = vmatpush3.msra.mxu1 %v55_v4 }
  0x31   :  { %1089 = vmatmul.mubr.msk.f32.gmra.mxu0 %vm102_vm1, %v81_v2  ;;  %1163 = vmatprep.subr.mxu1 %v1358_v1 }
  0x32   :  { %1091 = vmatprep.mubr.msk.f32.mxu0 %vm1359_vm0, %v1358_v1 }
  0x33   :  { %1128 = vmatmul.mubr.msk.f32.gmra.mxu1 %vm102_vm1, %v94_v6 }
  0x34   :  { %1130 = vmatprep.mubr.msk.f32.mxu1 %vm1359_vm0, %v1358_v1 }
  0x35   :  { %1092 = vmatmul.mubr.msk.f32.gmra.mxu0 %vm102_vm1, %v82_v11 }
  0x36   :  { %1094 = vmatprep.mubr.msk.f32.mxu0 %vm1359_vm0, %v1358_v1 }
  0x37   :  { %1131 = vmatmul.mubr.msk.f32.gmra.mxu1 %vm102_vm1, %v95_v14 }
  0x38   :  { %1165 = vmatprep.mubr.msk.f32.mxu1 %vm1359_vm0, %v1358_v1 }
  0x39   :  { %1095 = vmatmul.mubr.msk.f32.gmra.mxu0 %vm102_vm1, %v83_v15 }
  0x3a   :  { %1248 = vmatprep.mubr.msk.f32.mxu0 %vm1359_vm0, %v1358_v1 }
  0x3d   :  { %1249 = vmatmul.mubr.msk.f32.vlgmr.msra.gmra.mxu0 %vm102_vm1, %v1410_v3  ;;  %v54_v3 = vld [vmem:[%s2038_s3] sm:$0xff] }
  0x3e   :  { %1251 = vmatprep.mubr.msk.f32.mxu0 %vm1359_vm0, %v1358_v1  ;;  %1164 = vmatpush3.msra.mxu1 %v54_v3 }
  0x41   :  { %1252 = vmatmul.mubr.msk.f32.gmra.mxu0 %vm102_vm1, %v1431_v8 }
  0x42   :  { %1254 = vmatprep.mubr.msk.f32.mxu0 %vm1359_vm0, %v1358_v1 }
  0x45   :  { %1255 = vmatmul.mubr.msk.f32.gmra.mxu0 %vm102_vm1, %v1452_v13 }
  0x46   :  { %1257 = vmatprep.mubr.msk.f32.mxu0 %vm1359_vm0, %v1358_v1 }
  0x49   :  { %1258 = vmatmul.mubr.msk.f32.gmra.mxu0 %vm102_vm1, %v1480_v19 }
  0x4a   :  { %1260 = vmatprep.mubr.msk.f32.mxu0 %vm1359_vm0, %v1358_v1 }
  0x4d   :  { %1261 = vmatmul.mubr.msk.f32.gmra.mxu0 %vm102_vm1, %v1506_v25 }
  0x4e   :  { %1263 = vmatprep.mubr.msk.f32.mxu0 %vm1359_vm0, %v1358_v1 }
  0x51   :  { %1264 = vmatmul.mubr.msk.f32.gmra.mxu0 %vm102_vm1, %v1532_v31 }
  0x52   :  { %1266 = vmatprep.mubr.msk.f32.mxu0 %vm1359_vm0, %v1358_v1 }
  0x55   :  { %1267 = vmatmul.mubr.msk.f32.gmra.mxu0 %vm102_vm1, %v1558_v37 }
  0x56   :  { %1269 = vmatprep.mubr.msk.f32.mxu0 %vm1359_vm0, %v1358_v1 }
  0x59   :  { %1270 = vmatmul.mubr.msk.f32.gmra.mxu0 %vm102_vm1, %v1581_v42 }
  0x5a   :  { %1272 = vmatprep.mubr.msk.f32.mxu0 %vm1359_vm0, %v1358_v1 }
  0x5d   :  { %1273 = vmatmul.mubr.msk.f32.gmra.mxu0 %vm102_vm1, %v1610_v49 }
  0x5e   :  { %1275 = vmatprep.mubr.msk.f32.mxu0 %vm1359_vm0, %v1358_v1 }
  0x61   :  { %1276 = vmatmul.mubr.msk.f32.gmra.mxu0 %vm102_vm1, %v1636_v55 }
  0x62   :  { %1278 = vmatprep.mubr.msk.f32.mxu0 %vm1359_vm0, %v1358_v1 }
  0x65   :  { %1279 = vmatmul.mubr.msk.f32.gmra.mxu0 %vm102_vm1, %v34_v61 }
  0x66   :  { %1281 = vmatprep.mubr.msk.f32.mxu0 %vm1359_vm0, %v1358_v1 }
  0x69   :  { %1282 = vmatmul.mubr.msk.f32.gmra.mxu0 %vm102_vm1, %v35_v5 }
  0x6a   :  { %1284 = vmatprep.mubr.msk.f32.mxu0 %vm1359_vm0, %v1358_v1 }
  0x6d   :  { %1285 = vmatmul.mubr.msk.f32.gmra.mxu0 %vm102_vm1, %v36_v12 }
  0x6e   :  { %1287 = vmatprep.mubr.msk.f32.mxu0 %vm1359_vm0, %v1358_v1 }
  0x71   :  { %1288 = vmatmul.mubr.msk.f32.gmra.mxu0 %vm102_vm1, %v1426_v7  ;;  %v1816_v7 = vld [vmem:[%s2037_s2] ss:$0 sm:$0xff] }
  0x72   :  { %1290 = vmatprep.mubr.msk.f32.mxu0 %vm1359_vm0, %v1358_v1 }
  0x75   :  { %1291 = vmatmul.mubr.msk.f32.gmra.mxu0 %vm102_vm1, %v1440_v10 }
  0x76   :  { %1293 = vmatprep.mubr.msk.f32.mxu0 %vm1359_vm0, %v1358_v1 }
  0x79   :  { %1294 = vmatmul.mubr.msk.f32.gmra.mxu0 %vm102_vm1, %v1467_v16 }
  0x7a   :  { %1296 = vmatprep.mubr.msk.f32.mxu0 %vm1359_vm0, %v1358_v1 }
  0x7d   :  { %1297 = vmatmul.mubr.msk.f32.gmra.mxu0 %vm102_vm1, %v1493_v22 }
  0x7e   :  { %1299 = vmatprep.mubr.msk.f32.mxu0 %vm1359_vm0, %v1358_v1 }
  0x81   :  { %1300 = vmatmul.mubr.msk.f32.gmra.mxu0 %vm102_vm1, %v1516_v27 }
  0x82   :  { %1302 = vmatprep.mubr.msk.f32.mxu0 %vm1359_vm0, %v1358_v1 }
  0x85   :  { %1303 = vmatmul.mubr.msk.f32.gmra.mxu0 %vm102_vm1, %v1545_v34 }
  0x86   :  { %1305 = vmatprep.mubr.msk.f32.mxu0 %vm1359_vm0, %v1358_v1 }
  0x89   :  { %1306 = vmatmul.mubr.msk.f32.gmra.mxu0 %vm102_vm1, %v1571_v40 }
  0x8a   :  { %1308 = vmatprep.mubr.msk.f32.mxu0 %vm1359_vm0, %v1358_v1 }
  0x8d   :  { %1309 = vmatmul.mubr.msk.f32.gmra.mxu0 %vm102_vm1, %v1597_v46 }
  0x8e   :  { %1311 = vmatprep.mubr.msk.f32.mxu0 %vm1359_vm0, %v1358_v1 }
  0x91   :  { %1312 = vmatmul.mubr.msk.f32.gmra.mxu0 %vm102_vm1, %v1623_v52 }
  0x92   :  { %1314 = vmatprep.mubr.msk.f32.mxu0 %vm1359_vm0, %v1358_v1 }
  0x95   :  { %1315 = vmatmul.mubr.msk.f32.gmra.mxu0 %vm102_vm1, %v1649_v58 }
  0x96   :  { %1317 = vmatprep.mubr.msk.f32.mxu0 %vm1359_vm0, %v1358_v1 }
  0x99   :  { %1318 = vmatmul.mubr.msk.f32.gmra.mxu0 %vm102_vm1, %v1673_v0 }
  0x9a   :  { %1320 = vmatprep.mubr.msk.f32.mxu0 %vm1359_vm0, %v1358_v1 }
  0x9d   :  { %1321 = vmatmul.mubr.msk.f32.gmra.mxu0 %vm102_vm1, %v1693_v9 }
  0xc9   :  { %v244_v8 = vpop.f32.mrf.mxu0 }
  0xca   :  { %v245_v10 = vadd.f32 %v1816_v7, %v244_v8 }
  0xcb   :  { %v1060_v13 = vpop.f32.mrf.mxu0  ;;  %v1819_v16 = vpop.f32.mrf.mxu1 }
  0xcc   :  { %v368_v17 = vmax.f32 %v245_v10, 0.0 }
  0xcd   :  { %v249_v18 = vpop.f32.mrf.mxu0  ;;  %v1099_v19 = vpop.f32.mrf.mxu1 }
  0xce   :  { %v250_v20 = vadd.f32 %v1816_v7, %v249_v18  ;;  %1166 = vmatmul.mubr.f32.vlgmr.msra.gmra.mxu1 %v368_v17 }
  0xcf   :  { %v1063_v21 = vpop.f32.mrf.mxu0  ;;  %1168 = vmatprep.mubr.msk.f32.mxu1 %vm1359_vm0, %v1358_v1  ;;  %v1824_v22 = vpop.f32.mrf.mxu1 }
  0xd0   :  { %v369_v23 = vmax.f32 %v250_v20, 0.0 }
  0xd1   :  { %v254_v24 = vpop.f32.mrf.mxu0  ;;  %v1102_v25 = vpop.f32.mrf.mxu1 }
  0xd2   :  { %v255_v26 = vadd.f32 %v1816_v7, %v254_v24  ;;  %1169 = vmatmul.mubr.f32.gmra.mxu1 %v369_v23 }
  0xd3   :  { %v1066_v27 = vpop.f32.mrf.mxu0  ;;  %1171 = vmatprep.mubr.msk.f32.mxu1 %vm1359_vm0, %v1358_v1  ;;  %v1829_v28 = vpop.f32.mrf.mxu1 }
  0xd4   :  { %v370_v29 = vmax.f32 %v255_v26, 0.0  ;;  %v310_v27 = vadd.f32 %v1816_v7, %v1819_v16 }
  0xd5   :  { %v259_v30 = vpop.f32.mrf.mxu0  ;;  %v1105_v31 = vpop.f32.mrf.mxu1 }
  0xd6   :  { %v260_v32 = vadd.f32 %v1816_v7, %v259_v30  ;;  %1172 = vmatmul.mubr.f32.gmra.mxu1 %v370_v29  ;;  %v381_v31 = vmax.f32 %v310_v27, 0.0 }
  0xd7   :  { %v1069_v33 = vpop.f32.mrf.mxu0  ;;  %1174 = vmatprep.mubr.msk.f32.mxu1 %vm1359_vm0, %v1358_v1  ;;  %v1834_v34 = vpop.f32.mrf.mxu1 }
  0xd8   :  { %v371_v35 = vmax.f32 %v260_v32, 0.0  ;;  %v315_v32 = vadd.f32 %v1816_v7, %v1824_v22 }
  0xd9   :  { %v264_v36 = vpop.f32.mrf.mxu0  ;;  %v1108_v37 = vpop.f32.mrf.mxu1 }
  0xda   :  { %v265_v38 = vadd.f32 %v1816_v7, %v264_v36  ;;  %1175 = vmatmul.mubr.f32.gmra.mxu1 %v371_v35  ;;  %v382_v33 = vmax.f32 %v315_v32, 0.0  ;;  %v320_v35 = vadd.f32 %v1816_v7, %v1829_v28  ;;  %v325_v36 = vadd.f32 %v1816_v7, %v1834_v34 }
  0xdb   :  { %v1072_v39 = vpop.f32.mrf.mxu0  ;;  %1177 = vmatprep.mubr.msk.f32.mxu1 %vm1359_vm0, %v1358_v1  ;;  %v1839_v40 = vpop.f32.mrf.mxu1 }
  0xdc   :  { %v372_v41 = vmax.f32 %v265_v38, 0.0  ;;  %v383_v16 = vmax.f32 %v320_v35, 0.0  ;;  %v384_v22 = vmax.f32 %v325_v36, 0.0  ;;  %v330_v37 = vadd.f32 %v1816_v7, %v1839_v40 }
  0xdd   :  { %v269_v42 = vpop.f32.mrf.mxu0  ;;  %v1111_v43 = vpop.f32.mrf.mxu1 }
  0xde   :  { %v270_v44 = vadd.f32 %v1816_v7, %v269_v42  ;;  %1178 = vmatmul.mubr.f32.gmra.mxu1 %v372_v41  ;;  %v385_v28 = vmax.f32 %v330_v37, 0.0 }
  0xdf   :  { %v1075_v45 = vpop.f32.mrf.mxu0  ;;  %1180 = vmatprep.mubr.msk.f32.mxu1 %vm1359_vm0, %v1358_v1  ;;  %v1844_v46 = vpop.f32.mrf.mxu1 }
  0xe0   :  { %v373_v47 = vmax.f32 %v270_v44, 0.0  ;;  %v335_v38 = vadd.f32 %v1816_v7, %v1844_v46 }
  0xe1   :  { %v274_v48 = vpop.f32.mrf.mxu0  ;;  %v1114_v49 = vpop.f32.mrf.mxu1 }
  0xe2   :  { %v275_v50 = vadd.f32 %v1816_v7, %v274_v48  ;;  %1181 = vmatmul.mubr.f32.gmra.mxu1 %v373_v47  ;;  %v386_v41 = vmax.f32 %v335_v38, 0.0  ;;  %v1980_v38 = vld [vmem:[%s2039_s4] ss:$0 sm:$0xff]  ;;  %s1360_s4 = smov [#allocation2]  }
  0xe3   :  { %v1078_v51 = vpop.f32.mrf.mxu0  ;;  %1183 = vmatprep.mubr.msk.f32.mxu1 %vm1359_vm0, %v1358_v1  ;;  %v1849_v52 = vpop.f32.mrf.mxu1  ;;  %s888_s19 = sshll.u32 %s1360_s4, 4  ;;  %s889_s19 = int_to_ptr.vmem [resolvable:$true] %s888_s19 }
  0xe4   :  { %v374_v53 = vmax.f32 %v275_v50, 0.0  ;;  %v340_v42 = vadd.f32 %v1816_v7, %v1849_v52  ;;  %s1336_s20 = scalar_lea.vmem %s889_s19, 3200  ;;  %p1341_p1 = scmp.lt.s32.totalorder %s889_s19, %s889_s19 }
  0xe5   :  { %v279_v54 = vpop.f32.mrf.mxu0  ;;  %v1117_v55 = vpop.f32.mrf.mxu1  ;;  %p1337_p0 = scmp.ne.s32.totalorder %s889_s19, %s1336_s20  ;;  %p1342_p2 = scmp.lt.s32.totalorder %s1336_s20, %s1336_s20 }
  0xe6   :  { %v280_v56 = vadd.f32 %v1816_v7, %v279_v54  ;;  %1184 = vmatmul.mubr.f32.gmra.mxu1 %v374_v53  ;;  %v387_v44 = vmax.f32 %v340_v42, 0.0 }
  0xe7   :  { %v1081_v57 = vpop.f32.mrf.mxu0  ;;  %1186 = vmatprep.mubr.msk.f32.mxu1 %vm1359_vm0, %v1358_v1  ;;  %v1854_v58 = vpop.f32.mrf.mxu1  ;;  %p1343_p3 = por %p1342_p2, %p1341_p1 }
  0xe8   :  { %v375_v59 = vmax.f32 %v280_v56, 0.0  ;;  %v345_v45 = vadd.f32 %v1816_v7, %v1854_v58 }
  0xe9   :  { %v284_v60 = vpop.f32.mrf.mxu0  ;;  %v1120_v61 = vpop.f32.mrf.mxu1  ;;  %p1344_p4 = pnand %p1343_p3, %p1337_p0 }
  0xea   :  { %v285_v62 = vadd.f32 %v1816_v7, %v284_v60  ;;  %1187 = vmatmul.mubr.f32.gmra.mxu1 %v375_v59  ;;  %v388_v48 = vmax.f32 %v345_v45, 0.0 }
  0xeb   :  { %v1084_v63 = vpop.f32.mrf.mxu0  ;;  %1189 = vmatprep.mubr.msk.f32.mxu1 %vm1359_vm0, %v1358_v1  ;;  %v1859_v0 = vpop.f32.mrf.mxu1 }
  0xec   :  { %v376_v2 = vmax.f32 %v285_v62, 0.0  ;;  %v350_v49 = vadd.f32 %v1816_v7, %v1859_v0 }
  0xed   :  { %v289_v4 = vpop.f32.mrf.mxu0  ;;  %v1123_v5 = vpop.f32.mrf.mxu1 }
  0xee   :  { %v290_v6 = vadd.f32 %v1816_v7, %v289_v4  ;;  %1190 = vmatmul.mubr.f32.gmra.mxu1 %v376_v2  ;;  %v389_v52 = vmax.f32 %v350_v49, 0.0 }
  0xef   :  { %v1087_v9 = vpop.f32.mrf.mxu0  ;;  %1192 = vmatprep.mubr.msk.f32.mxu1 %vm1359_vm0, %v1358_v1  ;;  %v1864_v11 = vpop.f32.mrf.mxu1 }
  0xf0   :  { %v377_v12 = vmax.f32 %v290_v6, 0.0  ;;  %v355_v53 = vadd.f32 %v1816_v7, %v1864_v11 }
  0xf1   :  { %v294_v14 = vpop.f32.mrf.mxu0  ;;  %v1126_v15 = vpop.f32.mrf.mxu1 }
  0xf2   :  { %v295_v3 = vadd.f32 %v1816_v7, %v294_v14  ;;  %1193 = vmatmul.mubr.f32.gmra.mxu1 %v377_v12  ;;  %v390_v56 = vmax.f32 %v355_v53, 0.0 }
  0xf3   :  { %v1090_v8 = vpop.f32.mrf.mxu0  ;;  %1195 = vmatprep.mubr.msk.f32.mxu1 %vm1359_vm0, %v1358_v1  ;;  %v1869_v10 = vpop.f32.mrf.mxu1 }
  0xf4   :  { %v378_v13 = vmax.f32 %v295_v3, 0.0  ;;  %v360_v57 = vadd.f32 %v1816_v7, %v1869_v10 }
  0xf5   :  { %v299_v17 = vpop.f32.mrf.mxu0  ;;  %v1129_v18 = vpop.f32.mrf.mxu1 }
  0xf6   :  { %v300_v19 = vadd.f32 %v1816_v7, %v299_v17  ;;  %1196 = vmatmul.mubr.f32.gmra.mxu1 %v378_v13  ;;  %v391_v60 = vmax.f32 %v360_v57, 0.0 }
  0xf7   :  { %v1093_v20 = vpop.f32.mrf.mxu0  ;;  %1198 = vmatprep.mubr.msk.f32.mxu1 %vm1359_vm0, %v1358_v1  ;;  %v1874_v21 = vpop.f32.mrf.mxu1 }
  0xf8   :  { %v379_v23 = vmax.f32 %v300_v19, 0.0  ;;  %v365_v61 = vadd.f32 %v1816_v7, %v1874_v21 }
  0xf9   :  { %v304_v24 = vpop.f32.mrf.mxu0  ;;  %v1132_v25 = vpop.f32.mrf.mxu1 }
  0xfa   :  { %v305_v26 = vadd.f32 %v1816_v7, %v304_v24  ;;  %1199 = vmatmul.mubr.f32.gmra.mxu1 %v379_v23  ;;  %v392_v0 = vmax.f32 %v365_v61, 0.0 }
  0xfb   :  { %v1096_v29 = vpop.f32.mrf.mxu0  ;;  %1201 = vmatprep.mubr.msk.f32.mxu1 %vm1359_vm0, %v1358_v1 }
  0xfc   :  { %v380_v30 = vmax.f32 %v305_v26, 0.0 }
  0xfd   :  { %v1899_v39 = vpop.f32.mrf.mxu0 }
  0xfe   :  { %1202 = vmatmul.mubr.f32.gmra.mxu1 %v380_v30 }
  0xff   :  { %1204 = vmatprep.mubr.msk.f32.mxu1 %vm1359_vm0, %v1358_v1  ;;  %v1250_v34 = vpop.f32.mrf.mxu0 }
 0x101   :  { %v1905_v40 = vpop.f32.mrf.mxu0 }
 0x102   :  { %1205 = vmatmul.mubr.f32.gmra.mxu1 %v381_v31 }
 0x103   :  { %1207 = vmatprep.mubr.msk.f32.mxu1 %vm1359_vm0, %v1358_v1  ;;  %v1253_v43 = vpop.f32.mrf.mxu0 }
 0x105   :  { %v1911_v46 = vpop.f32.mrf.mxu0 }
 0x106   :  { %1208 = vmatmul.mubr.f32.gmra.mxu1 %v382_v33 }
 0x107   :  { %1210 = vmatprep.mubr.msk.f32.mxu1 %vm1359_vm0, %v1358_v1  ;;  %v1256_v47 = vpop.f32.mrf.mxu0 }
 0x109   :  { %v1917_v50 = vpop.f32.mrf.mxu0 }
 0x10a   :  { %1211 = vmatmul.mubr.f32.gmra.mxu1 %v383_v16 }
 0x10b   :  { %1213 = vmatprep.mubr.msk.f32.mxu1 %vm1359_vm0, %v1358_v1  ;;  %v1259_v51 = vpop.f32.mrf.mxu0 }
 0x10d   :  { %v1923_v54 = vpop.f32.mrf.mxu0 }
 0x10e   :  { %1214 = vmatmul.mubr.f32.gmra.mxu1 %v384_v22 }
 0x10f   :  { %1216 = vmatprep.mubr.msk.f32.mxu1 %vm1359_vm0, %v1358_v1  ;;  %v1262_v55 = vpop.f32.mrf.mxu0 }
 0x111   :  { %v1929_v58 = vpop.f32.mrf.mxu0 }
 0x112   :  { %1217 = vmatmul.mubr.f32.gmra.mxu1 %v385_v28 }
 0x113   :  { %1219 = vmatprep.mubr.msk.f32.mxu1 %vm1359_vm0, %v1358_v1  ;;  %v1265_v59 = vpop.f32.mrf.mxu0 }
 0x115   :  { %v1935_v62 = vpop.f32.mrf.mxu0 }
 0x116   :  { %1220 = vmatmul.mubr.f32.gmra.mxu1 %v386_v41 }
 0x117   :  { %1222 = vmatprep.mubr.msk.f32.mxu1 %vm1359_vm0, %v1358_v1  ;;  %v1268_v63 = vpop.f32.mrf.mxu0 }
 0x119   :  { %v1939_v2 = vpop.f32.mrf.mxu0 }
 0x11a   :  { %1223 = vmatmul.mubr.f32.gmra.mxu1 %v387_v44 }
 0x11b   :  { %1225 = vmatprep.mubr.msk.f32.mxu1 %vm1359_vm0, %v1358_v1  ;;  %v1271_v4 = vpop.f32.mrf.mxu0 }
 0x11d   :  { %v1943_v5 = vpop.f32.mrf.mxu0 }
 0x11e   :  { %1226 = vmatmul.mubr.f32.gmra.mxu1 %v388_v48 }
 0x11f   :  { %1228 = vmatprep.mubr.msk.f32.mxu1 %vm1359_vm0, %v1358_v1  ;;  %v1274_v6 = vpop.f32.mrf.mxu0 }
 0x121   :  { %v1945_v9 = vpop.f32.mrf.mxu0 }
 0x122   :  { %1229 = vmatmul.mubr.f32.gmra.mxu1 %v389_v52 }
 0x123   :  { %1231 = vmatprep.mubr.msk.f32.mxu1 %vm1359_vm0, %v1358_v1  ;;  %v1277_v7 = vpop.f32.mrf.mxu0 }
 0x125   :  { %v1947_v11 = vpop.f32.mrf.mxu0 }
 0x126   :  { %1232 = vmatmul.mubr.f32.gmra.mxu1 %v390_v56 }
 0x127   :  { %1234 = vmatprep.mubr.msk.f32.mxu1 %vm1359_vm0, %v1358_v1  ;;  %v1280_v12 = vpop.f32.mrf.mxu0 }
 0x129   :  { %v1949_v14 = vpop.f32.mrf.mxu0 }
 0x12a   :  { %1235 = vmatmul.mubr.f32.gmra.mxu1 %v391_v60 }
 0x12b   :  { %1237 = vmatprep.mubr.msk.f32.mxu1 %vm1359_vm0, %v1358_v1  ;;  %v1283_v15 = vpop.f32.mrf.mxu0 }
 0x12d   :  { %v1951_v3 = vpop.f32.mrf.mxu0 }
 0x12e   :  { %1238 = vmatmul.mubr.f32.gmra.mxu1 %v392_v0 }
 0x12f   :  { %v1286_v8 = vpop.f32.mrf.mxu0 }
 0x131   :  { %v1953_v10 = vpop.f32.mrf.mxu0 }
 0x133   :  { %v1289_v1 = vpop.f32.mrf.mxu0 }
 0x135   :  { %v1955_v13 = vpop.f32.mrf.mxu0 }
 0x137   :  { %v1292_v17 = vpop.f32.mrf.mxu0 }
 0x139   :  { %v1957_v18 = vpop.f32.mrf.mxu0 }
 0x13b   :  { %v1295_v19 = vpop.f32.mrf.mxu0 }
 0x13d   :  { %v1959_v20 = vpop.f32.mrf.mxu0 }
 0x13f   :  { %v1298_v21 = vpop.f32.mrf.mxu0 }
 0x141   :  { %v1961_v23 = vpop.f32.mrf.mxu0 }
 0x143   :  { %v1301_v24 = vpop.f32.mrf.mxu0 }
 0x145   :  { %v1963_v25 = vpop.f32.mrf.mxu0 }
 0x147   :  { %v1304_v26 = vpop.f32.mrf.mxu0 }
 0x149   :  { %v1965_v27 = vpop.f32.mrf.mxu0 }
 0x14b   :  { %v1307_v29 = vpop.f32.mrf.mxu0 }
 0x14d   :  { %v1967_v30 = vpop.f32.mrf.mxu0 }
 0x14f   :  { %v1310_v31 = vpop.f32.mrf.mxu0 }
 0x151   :  { %v1969_v32 = vpop.f32.mrf.mxu0 }
 0x153   :  { %v1313_v33 = vpop.f32.mrf.mxu0 }
 0x155   :  { %v1971_v35 = vpop.f32.mrf.mxu0 }
 0x157   :  { %v1316_v16 = vpop.f32.mrf.mxu0 }
 0x159   :  { %v1973_v36 = vpop.f32.mrf.mxu0 }
 0x15b   :  { %v1319_v22 = vpop.f32.mrf.mxu0 }
 0x15d   :  { %v1975_v37 = vpop.f32.mrf.mxu0 }
 0x15f   :  { %v1322_v28 = vpop.f32.mrf.mxu0 }
 0x18e   :  { %v465_v34 = vpop.f32.mrf.mxu1 }
 0x18f   :  { %v466_v41 = vadd.f32 %v1980_v38, %v465_v34 }
 0x190   :  { %v1167_v42 = vpop.f32.mrf.mxu1 }
 0x191   :  { %v735_v43 = vadd.f32 %v1899_v39, %v466_v41 }
 0x192   :  { %v470_v44 = vpop.f32.mrf.mxu1 }
 0x193   :  { %858 = vst [vmem:[#allocation2] sm:$0xff] %v735_v43  ;;  %v471_v45 = vadd.f32 %v1980_v38, %v470_v44 }
 0x194   :  { %v1170_v47 = vpop.f32.mrf.mxu1 }
 0x195   :  { %v740_v48 = vadd.f32 %v1905_v40, %v471_v45 }
 0x196   :  { %v475_v49 = vpop.f32.mrf.mxu1 }
 0x197   :  { %859 = vst [vmem:[#allocation2 + $0x8] sm:$0xff] %v740_v48  ;;  %v476_v51 = vadd.f32 %v1980_v38, %v475_v49 }
 0x198   :  { %v1173_v52 = vpop.f32.mrf.mxu1 }
 0x199   :  { %v745_v53 = vadd.f32 %v1911_v46, %v476_v51 }
 0x19a   :  { %v480_v55 = vpop.f32.mrf.mxu1 }
 0x19b   :  { %860 = vst [vmem:[#allocation2 + $0x10] sm:$0xff] %v745_v53  ;;  %v481_v56 = vadd.f32 %v1980_v38, %v480_v55 }
 0x19c   :  { %v1176_v57 = vpop.f32.mrf.mxu1 }
 0x19d   :  { %v750_v39 = vadd.f32 %v1917_v50, %v481_v56 }
 0x19e   :  { %v485_v59 = vpop.f32.mrf.mxu1 }
 0x19f   :  { %861 = vst [vmem:[#allocation2 + $0x18] sm:$0xff] %v750_v39  ;;  %v486_v60 = vadd.f32 %v1980_v38, %v485_v59 }
 0x1a0   :  { %v1179_v61 = vpop.f32.mrf.mxu1 }
 0x1a1   :  { %v755_v40 = vadd.f32 %v1923_v54, %v486_v60 }
 0x1a2   :  { %v490_v63 = vpop.f32.mrf.mxu1 }
 0x1a3   :  { %862 = vst [vmem:[#allocation2 + $0x20] sm:$0xff] %v755_v40  ;;  %v491_v0 = vadd.f32 %v1980_v38, %v490_v63 }
 0x1a4   :  { %v1182_v4 = vpop.f32.mrf.mxu1 }
 0x1a5   :  { %v760_v46 = vadd.f32 %v1929_v58, %v491_v0 }
 0x1a6   :  { %v495_v6 = vpop.f32.mrf.mxu1 }
 0x1a7   :  { %863 = vst [vmem:[#allocation2 + $0x28] sm:$0xff] %v760_v46  ;;  %v496_v7 = vadd.f32 %v1980_v38, %v495_v6 }
 0x1a8   :  { %v1185_v12 = vpop.f32.mrf.mxu1 }
 0x1a9   :  { %v765_v50 = vadd.f32 %v1935_v62, %v496_v7 }
 0x1aa   :  { %v500_v15 = vpop.f32.mrf.mxu1 }
 0x1ab   :  { %864 = vst [vmem:[#allocation2 + $0x30] sm:$0xff] %v765_v50  ;;  %v501_v8 = vadd.f32 %v1980_v38, %v500_v15 }
 0x1ac   :  { %v1188_v1 = vpop.f32.mrf.mxu1 }
 0x1ad   :  { %v770_v54 = vadd.f32 %v1939_v2, %v501_v8 }
 0x1ae   :  { %v505_v17 = vpop.f32.mrf.mxu1 }
 0x1af   :  { %865 = vst [vmem:[#allocation2 + $0x38] sm:$0xff] %v770_v54  ;;  %v506_v19 = vadd.f32 %v1980_v38, %v505_v17 }
 0x1b0   :  { %v1191_v21 = vpop.f32.mrf.mxu1 }
 0x1b1   :  { %v775_v58 = vadd.f32 %v1943_v5, %v506_v19 }
 0x1b2   :  { %v510_v24 = vpop.f32.mrf.mxu1 }
 0x1b3   :  { %866 = vst [vmem:[#allocation2 + $0x40] sm:$0xff] %v775_v58  ;;  %v511_v26 = vadd.f32 %v1980_v38, %v510_v24 }
 0x1b4   :  { %v1194_v29 = vpop.f32.mrf.mxu1 }
 0x1b5   :  { %v780_v62 = vadd.f32 %v1945_v9, %v511_v26 }
 0x1b6   :  { %v515_v31 = vpop.f32.mrf.mxu1 }
 0x1b7   :  { %867 = vst [vmem:[#allocation2 + $0x48] sm:$0xff] %v780_v62  ;;  %v516_v33 = vadd.f32 %v1980_v38, %v515_v31 }
 0x1b8   :  { %v1197_v16 = vpop.f32.mrf.mxu1 }
 0x1b9   :  { %v785_v2 = vadd.f32 %v1947_v11, %v516_v33 }
 0x1ba   :  { %v520_v22 = vpop.f32.mrf.mxu1 }
 0x1bb   :  { %868 = vst [vmem:[#allocation2 + $0x50] sm:$0xff] %v785_v2  ;;  %v521_v28 = vadd.f32 %v1980_v38, %v520_v22 }
 0x1bc   :  { %v1200_v34 = vpop.f32.mrf.mxu1 }
 0x1bd   :  { %v790_v5 = vadd.f32 %v1949_v14, %v521_v28 }
 0x1be   :  { %v525_v41 = vpop.f32.mrf.mxu1 }
 0x1bf   :  { %869 = vst [vmem:[#allocation2 + $0x58] sm:$0xff] %v790_v5  ;;  %v526_v42 = vadd.f32 %v1980_v38, %v525_v41 }
 0x1c0   :  { %v1203_v43 = vpop.f32.mrf.mxu1 }
 0x1c1   :  { %v795_v9 = vadd.f32 %v1951_v3, %v526_v42 }
 0x1c2   :  { %v530_v44 = vpop.f32.mrf.mxu1 }
 0x1c3   :  { %870 = vst [vmem:[#allocation2 + $0x60] sm:$0xff] %v795_v9  ;;  %v531_v45 = vadd.f32 %v1980_v38, %v530_v44 }
 0x1c4   :  { %v1206_v47 = vpop.f32.mrf.mxu1 }
 0x1c5   :  { %v800_v11 = vadd.f32 %v1953_v10, %v531_v45 }
 0x1c6   :  { %v535_v48 = vpop.f32.mrf.mxu1 }
 0x1c7   :  { %871 = vst [vmem:[#allocation2 + $0x68] sm:$0xff] %v800_v11  ;;  %v536_v49 = vadd.f32 %v1980_v38, %v535_v48 }
 0x1c8   :  { %v1209_v51 = vpop.f32.mrf.mxu1 }
 0x1c9   :  { %v805_v14 = vadd.f32 %v1955_v13, %v536_v49 }
 0x1ca   :  { %v540_v52 = vpop.f32.mrf.mxu1 }
 0x1cb   :  { %872 = vst [vmem:[#allocation2 + $0x70] sm:$0xff] %v805_v14  ;;  %v541_v53 = vadd.f32 %v1980_v38, %v540_v52 }
 0x1cc   :  { %v1212_v55 = vpop.f32.mrf.mxu1 }
 0x1cd   :  { %v810_v3 = vadd.f32 %v1957_v18, %v541_v53 }
 0x1ce   :  { %v545_v56 = vpop.f32.mrf.mxu1 }
 0x1cf   :  { %873 = vst [vmem:[#allocation2 + $0x78] sm:$0xff] %v810_v3  ;;  %v546_v57 = vadd.f32 %v1980_v38, %v545_v56 }
 0x1d0   :  { %v1215_v39 = vpop.f32.mrf.mxu1 }
 0x1d1   :  { %v815_v10 = vadd.f32 %v1959_v20, %v546_v57 }
 0x1d2   :  { %v550_v59 = vpop.f32.mrf.mxu1 }
 0x1d3   :  { %874 = vst [vmem:[#allocation2 + $0x80] sm:$0xff] %v815_v10  ;;  %v551_v60 = vadd.f32 %v1980_v38, %v550_v59 }
 0x1d4   :  { %v1218_v61 = vpop.f32.mrf.mxu1 }
 0x1d5   :  { %v820_v13 = vadd.f32 %v1961_v23, %v551_v60 }
 0x1d6   :  { %v555_v40 = vpop.f32.mrf.mxu1 }
 0x1d7   :  { %875 = vst [vmem:[#allocation2 + $0x88] sm:$0xff] %v820_v13  ;;  %v556_v63 = vadd.f32 %v1980_v38, %v555_v40 }
 0x1d8   :  { %v1221_v0 = vpop.f32.mrf.mxu1 }
 0x1d9   :  { %v825_v18 = vadd.f32 %v1963_v25, %v556_v63 }
 0x1da   :  { %v560_v4 = vpop.f32.mrf.mxu1 }
 0x1db   :  { %876 = vst [vmem:[#allocation2 + $0x90] sm:$0xff] %v825_v18  ;;  %v561_v46 = vadd.f32 %v1980_v38, %v560_v4 }
 0x1dc   :  { %v1224_v6 = vpop.f32.mrf.mxu1 }
 0x1dd   :  { %v830_v20 = vadd.f32 %v1965_v27, %v561_v46 }
 0x1de   :  { %v565_v7 = vpop.f32.mrf.mxu1 }
 0x1df   :  { %877 = vst [vmem:[#allocation2 + $0x98] sm:$0xff] %v830_v20  ;;  %v566_v12 = vadd.f32 %v1980_v38, %v565_v7 }
 0x1e0   :  { %v1227_v50 = vpop.f32.mrf.mxu1 }
 0x1e1   :  { %v835_v23 = vadd.f32 %v1967_v30, %v566_v12 }
 0x1e2   :  { %v570_v15 = vpop.f32.mrf.mxu1 }
 0x1e3   :  { %878 = vst [vmem:[#allocation2 + $0xa0] sm:$0xff] %v835_v23  ;;  %v571_v8 = vadd.f32 %v1980_v38, %v570_v15 }
 0x1e4   :  { %v1230_v1 = vpop.f32.mrf.mxu1 }
 0x1e5   :  { %v840_v25 = vadd.f32 %v1969_v32, %v571_v8 }
 0x1e6   :  { %v575_v54 = vpop.f32.mrf.mxu1 }
 0x1e7   :  { %879 = vst [vmem:[#allocation2 + $0xa8] sm:$0xff] %v840_v25  ;;  %v576_v17 = vadd.f32 %v1980_v38, %v575_v54 }
 0x1e8   :  { %v1233_v19 = vpop.f32.mrf.mxu1 }
 0x1e9   :  { %v845_v27 = vadd.f32 %v1971_v35, %v576_v17 }
 0x1ea   :  { %v580_v21 = vpop.f32.mrf.mxu1 }
 0x1eb   :  { %880 = vst [vmem:[#allocation2 + $0xb0] sm:$0xff] %v845_v27  ;;  %v581_v58 = vadd.f32 %v1980_v38, %v580_v21 }
 0x1ec   :  { %v1236_v24 = vpop.f32.mrf.mxu1 }
 0x1ed   :  { %v850_v30 = vadd.f32 %v1973_v36, %v581_v58 }
 0x1ee   :  { %v585_v26 = vpop.f32.mrf.mxu1 }
 0x1ef   :  { %881 = vst [vmem:[#allocation2 + $0xb8] sm:$0xff] %v850_v30  ;;  %v586_v32 = vadd.f32 %v1980_v38, %v585_v26 }
 0x1f0   :  { %v1239_v29 = vpop.f32.mrf.mxu1 }
 0x1f1   :  { %v855_v62 = vadd.f32 %v1975_v37, %v586_v32 }
 0x1f3   :  { %882 = vst [vmem:[#allocation2 + $0xc0] sm:$0xff] %v855_v62 }
 0x1f4   :  { %1347 = shalt.err (!%p1344_p4)
}
 0x1f5   :  { %s1361_s21 = smov 128   ;;  %s1362_s22 = smov 8  }
 0x1f6   :  { %894 = dma.vmem_to_hbm [thread:$0]  %s889_s19, 3200, %s2041_s6, [#allocation3], %s1361_s21, %s1361_s21, %s1362_s22  }
 0x1f7   :  { %1356 = dma.done.wait [#allocation3], 3200  }
 0x1f8   :  { %1357 = vsyncadd [#allocation3], 4294964096 }
 0x1f9   :  { %898 = vsyncpa [#allocation3], 1 }

</bundles_post_ra>
